<compile_context>
chip_gen: v7x
topology: tpu7x:2x2x1
jax: 0.10.0
libtpu: 0.0.40
codegen_flags: <defaults>
</compile_context>

<pallas_src>
import functools
import math

import jax
import jax.numpy as jnp
from jax.experimental import pallas as pl
from jax.experimental.pallas import tpu as pltpu

KDIM = 16  # fixed key width used by gll_read / gll_write in the module


def _shared_block_lstm_kernel(xh_ref, c_ref, w_ref,
                              hnext_ref, cnext_ref, att_ref,
                              *, n_templates, hid):
    # xh_ref: (TM, din+hid+1)  = [x | h | 1]          (MXU operand dtype)
    # c_ref:  (TM, hid)                               (VPU state, f32 math)
    # w_ref:  (din+hid+1, 5*T*hid) fused weights:
    #         rows    = [x rows | h rows | bias row]
    #         columns = [i | f | g | o gate slabs (T*hid each, [template][hid]
    #                    within a slab) | W_read@W_write_t^T projection (T*hid)]
    # outputs: hnext (TM, hid), cnext (TM, hid), att (TM, T)
    T = n_templates
    th = T * hid

    # One fused lane-dense matmul: all templates' gates + write-key projection.
    big = jnp.dot(xh_ref[...], w_ref[...], preferred_element_type=jnp.float32)

    c = c_ref[...].astype(jnp.float32)

    # Lane-dense (TM, T*hid) gate slabs -> one sigmoid/tanh per slab.
    i_all = jax.nn.sigmoid(big[:, 0 * th:1 * th])
    f_all = jax.nn.sigmoid(big[:, 1 * th:2 * th])
    g_all = jnp.tanh(big[:, 2 * th:3 * th])
    o_all = jax.nn.sigmoid(big[:, 3 * th:4 * th])
    proj = big[:, 4 * th:5 * th]                # h @ (W_read @ W_write_t^T) per block

    c_rep = jnp.concatenate([c] * T, axis=-1)   # broadcast c once, lane-dense
    c_all = f_all * c_rep + i_all * g_all       # (TM, T*hid): every template's c'
    h_all = o_all * jnp.tanh(c_all)             # (TM, T*hid): every template's h'

    # score_t = r . (h_t @ W_write_t) == h_t . proj_t : one lane-dense product,
    # then T tiny lane-reductions (T is static and small -> unrolled).
    prod = h_all * proj
    scores = jnp.concatenate(
        [jnp.sum(prod[:, t * hid:(t + 1) * hid], axis=-1, keepdims=True)
         for t in range(T)], axis=-1)           # (TM, T)

    # Exact softmax (exact division so att rows sum to 1).
    s_max = jnp.max(scores, axis=-1, keepdims=True)
    e = jnp.exp(scores - s_max)
    att = e / jnp.sum(e, axis=-1, keepdims=True)

    # Attention-weighted combination (f32 accumulators, VPU only).
    h_out = jnp.zeros_like(c)
    c_out = jnp.zeros_like(c)
    for t in range(T):
        a_t = att[:, t:t + 1]
        h_out = h_out + a_t * h_all[:, t * hid:(t + 1) * hid]
        c_out = c_out + a_t * c_all[:, t * hid:(t + 1) * hid]

    # TODO(synk): outputs are 32/32/4 lanes wide (masked vst); fuse them into a
    # lane-dense slab only if profiling ever shows the kernel store-bound.
    hnext_ref[...] = h_out.astype(hnext_ref.dtype)
    cnext_ref[...] = c_out.astype(cnext_ref.dtype)
    att_ref[...] = att.astype(att_ref.dtype)


def prepare_shared_block_lstm_params(w_ih, w_hh, b_ih, b_hh, w_read, w_write,
                                     *, mxu_dtype=None):
    """One-time weight fusion (hoisted out of the per-timestep call).

    w_ih: (T, 4*hid, din), w_hh: (T, 4*hid, hid), b_ih/b_hh: (T, 4*hid)
    w_read: (hid, KDIM) [= gll_read.w[0]],  w_write: (T, hid, KDIM) [= gll_write.w]
    Returns the single fused weight matrix W_big of shape (din+hid+1, 5*T*hid).
    """
    t, four_hid, din = w_ih.shape
    hid = four_hid // 4
    th = t * hid
    assert w_hh.shape == (t, 4 * hid, hid)
    assert b_ih.shape == (t, 4 * hid) and b_hh.shape == (t, 4 * hid)
    assert w_read.shape == (hid, KDIM) and w_write.shape == (t, hid, KDIM)

    f32 = jnp.float32
    # Regroup gate columns to [gate][template][hid] (lane-dense gate slabs).
    w_ih_cat = jnp.transpose(w_ih.astype(f32).reshape(t, 4, hid, din),
                             (3, 1, 0, 2)).reshape(din, 4 * th)
    w_hh_cat = jnp.transpose(w_hh.astype(f32).reshape(t, 4, hid, hid),
                             (3, 1, 0, 2)).reshape(hid, 4 * th)
    b_cat = jnp.transpose((b_ih + b_hh).astype(f32).reshape(t, 4, hid),
                          (1, 0, 2)).reshape(1, 4 * th)
    # Exact reassociation: score_t = r.(h_t @ W_write_t) = h_t.(h @ (W_read @ W_write_t^T))
    w_write_r = jnp.transpose(w_write.astype(f32), (2, 0, 1)).reshape(KDIM, th)
    w_rw = jnp.dot(w_read.astype(f32), w_write_r)          # (hid, T*hid)

    w_big = jnp.concatenate([
        jnp.concatenate([w_ih_cat, jnp.zeros((din, th), f32)], axis=1),
        jnp.concatenate([w_hh_cat, w_rw], axis=1),
        jnp.concatenate([b_cat, jnp.zeros((1, th), f32)], axis=1),
    ], axis=0)                                              # (din+hid+1, 5*T*hid)

    if mxu_dtype is not None:
        w_big = w_big.astype(mxu_dtype)
    return {"w_big": w_big, "n_templates": t, "hid": hid, "din": din,
            "mxu_dtype": mxu_dtype}


def shared_block_lstm(x, h, c, params, *, num_hidden, tile_m=None):
    """SharedBlockLSTM forward.

    x: (bs, ninp), h/c: (bs, nhid) with ninp = num_hidden*din, nhid = num_hidden*hid.
    Returns (hnext (bs, nhid), cnext (bs, nhid), att (bs, num_hidden, T)).
    """
    w_big = params["w_big"]
    t, hid, din = params["n_templates"], params["hid"], params["din"]
    mxu_dtype = params["mxu_dtype"]

    bs, ninp = x.shape
    assert ninp == num_hidden * din
    assert h.shape == (bs, num_hidden * hid) and c.shape == h.shape

    n = bs * num_hidden
    x_flat = x.reshape(n, din)
    h_flat = h.reshape(n, hid)
    c_flat = c.reshape(n, hid)

    # [x | h | 1]: the ones column pairs with the fused-bias row of W_big.
    xh = jnp.concatenate(
        [x_flat, h_flat, jnp.ones((n, 1), x_flat.dtype)], axis=-1)
    if mxu_dtype is not None:
        xh = xh.astype(mxu_dtype)   # MXU operands only; c / gate math stay f32
    kw = din + hid + 1

    # Largest row tile that keeps grid >= 2 (pipelining + v7x megacore sharding),
    # sublane-aligned (16 for sub-32-bit MXU operands, 8 otherwise).
    sub = 8 if (mxu_dtype is None or jnp.dtype(mxu_dtype).itemsize >= 4) else 16
    if tile_m is None:
        tile_m = n
        for cand in (2048, 1024, 512, 256, 128, 64, 32, 16, 8):
            if cand % sub == 0 and n % cand == 0 and n // cand >= 2:
                tile_m = cand
                break
    assert n % tile_m == 0, "row count must be divisible by tile_m"
    assert tile_m == n or tile_m % sub == 0, "tile_m must be sublane-aligned"
    grid = (n // tile_m,)

    kernel = functools.partial(_shared_block_lstm_kernel,
                               n_templates=t, hid=hid)
    out_shape = (
        jax.ShapeDtypeStruct((n, hid), h.dtype),
        jax.ShapeDtypeStruct((n, hid), h.dtype),
        jax.ShapeDtypeStruct((n, t), h.dtype),
    )

    # TODO(synk): on v7x, single-buffer the grid-invariant w_big operand
    # (pipeline_mode=pl.Buffered(1)) and set vmem_limit_bytes if tile_m is
    # pushed into the thousands; defaults are ample at these shapes.
    hn, cn, att = pl.pallas_call(
        kernel,
        out_shape=out_shape,
        grid_spec=pltpu.PrefetchScalarGridSpec(
            num_scalar_prefetch=0,
            grid=grid,
            in_specs=[
                pl.BlockSpec((tile_m, kw), lambda i: (i, 0)),
                pl.BlockSpec((tile_m, hid), lambda i: (i, 0)),
                pl.BlockSpec((kw, 5 * t * hid), lambda i: (0, 0)),
            ],
            out_specs=[
                pl.BlockSpec((tile_m, hid), lambda i: (i, 0)),
                pl.BlockSpec((tile_m, hid), lambda i: (i, 0)),
                pl.BlockSpec((tile_m, t), lambda i: (i, 0)),
            ],
        ),
        compiler_params=pltpu.CompilerParams(
            dimension_semantics=("parallel",),
        ),
    )(xh, c_flat, w_big)

    return (hn.reshape(bs, num_hidden * hid),
            cn.reshape(bs, num_hidden * hid),
            att.reshape(bs, num_hidden, t))


def shared_block_lstm_reference(x, h, c, w_ih, w_hh, b_ih, b_hh,
                                w_read, w_write, *, num_hidden):
    """Pure-JAX reference mirroring the PyTorch forward exactly."""
    bs = h.shape[0]
    t, four_hid, din = w_ih.shape
    hid = four_hid // 4
    xf = x.reshape(bs * num_hidden, din)
    hf = h.reshape(bs * num_hidden, hid)
    cf = c.reshape(bs * num_hidden, hid)

    h_read = hf @ w_read                                     # (N, KDIM)
    h_list, c_list = [], []
    for k in range(t):
        gates = xf @ w_ih[k].T + b_ih[k] + hf @ w_hh[k].T + b_hh[k]
        i_g, f_g, g_g, o_g = jnp.split(gates, 4, axis=-1)
        i_g = jax.nn.sigmoid(i_g)
        f_g = jax.nn.sigmoid(f_g)
        g_g = jnp.tanh(g_g)
        o_g = jax.nn.sigmoid(o_g)
        c_k = f_g * cf + i_g * g_g
        h_k = o_g * jnp.tanh(c_k)
        h_list.append(h_k)
        c_list.append(c_k)
    hstack = jnp.stack(h_list, axis=1)                       # (N, T, hid)
    cstack = jnp.stack(c_list, axis=1)
    wk = jnp.einsum("nth,thk->ntk", hstack, w_write)         # (N, T, KDIM)
    scores = jnp.einsum("nk,ntk->nt", h_read, wk)            # (N, T)
    att = jax.nn.softmax(scores, axis=-1)
    hn = jnp.einsum("nt,nth->nh", att, hstack)
    cn = jnp.einsum("nt,nth->nh", att, cstack)
    return (hn.reshape(bs, num_hidden * hid),
            cn.reshape(bs, num_hidden * hid),
            att.reshape(bs, num_hidden, t))


if __name__ == "__main__":
    # Small shapes consistent with the module's forward.
    bs, num_hidden, n_templates = 16, 4, 4
    ninp, nhid = 64, 128
    din = ninp // num_hidden   # 16
    hid = nhid // num_hidden   # 32

    key = jax.random.PRNGKey(0)
    keys = jax.random.split(key, 9)

    x = jax.random.normal(keys[0], (bs, ninp), jnp.float32)
    h = jax.random.normal(keys[1], (bs, nhid), jnp.float32)
    c = jax.random.normal(keys[2], (bs, nhid), jnp.float32)

    scale = 1.0 / math.sqrt(hid)  # LSTMCell-style init scale
    w_ih = scale * jax.random.normal(keys[3], (n_templates, 4 * hid, din), jnp.float32)
    w_hh = scale * jax.random.normal(keys[4], (n_templates, 4 * hid, hid), jnp.float32)
    b_ih = scale * jax.random.normal(keys[5], (n_templates, 4 * hid), jnp.float32)
    b_hh = scale * jax.random.normal(keys[6], (n_templates, 4 * hid), jnp.float32)
    w_read = 0.01 * jax.random.normal(keys[7], (hid, KDIM), jnp.float32)        # gll_read.w[0]
    w_write = 0.01 * jax.random.normal(keys[8], (n_templates, hid, KDIM), jnp.float32)  # gll_write.w

    hn_r, cn_r, att_r = shared_block_lstm_reference(
        x, h, c, w_ih, w_hh, b_ih, b_hh, w_read, w_write, num_hidden=num_hidden)

    # Default path: f32 MXU operands (v5e-friendly).
    params = prepare_shared_block_lstm_params(w_ih, w_hh, b_ih, b_hh,
                                              w_read, w_write)
    hn, cn, att = jax.block_until_ready(
        shared_block_lstm(x, h, c, params, num_hidden=num_hidden))

    assert hn.shape == (bs, nhid) and cn.shape == (bs, nhid)
    assert att.shape == (bs, num_hidden, n_templates)
    # Tolerance covers TPU default matmul precision in the reference plus the
    # (exact, but reordered) weight fusions in the kernel.
    assert jnp.allclose(hn, hn_r, atol=2e-2, rtol=2e-2), "hnext mismatch vs reference"
    assert jnp.allclose(cn, cn_r, atol=2e-2, rtol=2e-2), "cnext mismatch vs reference"
    assert jnp.allclose(att, att_r, atol=2e-2, rtol=2e-2), "att mismatch vs reference"

    # bf16 MXU-operand path (recommended on v6e/v7x); gate/softmax math stays f32.
    params_bf16 = prepare_shared_block_lstm_params(
        w_ih, w_hh, b_ih, b_hh, w_read, w_write, mxu_dtype=jnp.bfloat16)
    hn_b, cn_b, att_b = jax.block_until_ready(
        shared_block_lstm(x, h, c, params_bf16, num_hidden=num_hidden))
    # Loose tolerance: bf16 operand rounding; still catches any layout/gate bug.
    assert jnp.allclose(hn_b, hn_r, atol=1e-1, rtol=1e-1), "hnext (bf16) mismatch"
    assert jnp.allclose(cn_b, cn_r, atol=1e-1, rtol=1e-1), "cnext (bf16) mismatch"
    assert jnp.allclose(att_b, att_r, atol=1e-1, rtol=1e-1), "att (bf16) mismatch"

    print("KERNEL_OK")
</pallas_src>

<mosaic_0001>
module attributes {stable_mosaic.version = 11 : i64} {
  func.func @_shared_block_lstm_kernel(%arg0: i32, %arg1: memref<32x49xf32, #tpu.memory_space<vmem>>, %arg2: memref<32x32xf32, #tpu.memory_space<vmem>>, %arg3: memref<49x640xf32, #tpu.memory_space<vmem>>, %arg4: memref<32x32xf32, #tpu.memory_space<vmem>>, %arg5: memref<32x32xf32, #tpu.memory_space<vmem>>, %arg6: memref<32x4xf32, #tpu.memory_space<vmem>>) attributes {dimension_semantics = [#tpu.dimension_semantics<parallel>], iteration_bounds = array<i64: 2>, scalar_prefetch = 0 : i64, scratch_operands = 0 : i64, tpu.core_type = #tpu.core_type<tc>, window_params = [{transform_indices = @transform_0, window_bounds = array<i64: 32, 49>}, {transform_indices = @transform_1, window_bounds = array<i64: 32, 32>}, {pipeline_mode = #tpu.pipeline_mode<synchronous>, transform_indices = @transform_2, window_bounds = array<i64: 49, 640>}, {transform_indices = @transform_3, window_bounds = array<i64: 32, 32>}, {transform_indices = @transform_4, window_bounds = array<i64: 32, 32>}, {transform_indices = @transform_5, window_bounds = array<i64: 32, 4>}]} {
    %c0 = arith.constant 0 : index
    %c0_0 = arith.constant 0 : index
    %0 = vector.load %arg1[%c0, %c0_0] : memref<32x49xf32, #tpu.memory_space<vmem>>, vector<32x49xf32>
    %c0_1 = arith.constant 0 : index
    %c0_2 = arith.constant 0 : index
    %1 = vector.load %arg3[%c0_1, %c0_2] : memref<49x640xf32, #tpu.memory_space<vmem>>, vector<49x640xf32>
    %cst = arith.constant dense<0.000000e+00> : vector<32x640xf32>
    %2 = tpu.matmul %0, %1, %cst {dimension_numbers = #tpu.dot_dimension_numbers<[1], [0], [0], [1], [0, 0, 1, 1], [], []>} : vector<32x49xf32>, vector<49x640xf32>, vector<32x640xf32> -> vector<32x640xf32>
    %c0_3 = arith.constant 0 : index
    %c0_4 = arith.constant 0 : index
    %3 = vector.load %arg2[%c0_3, %c0_4] : memref<32x32xf32, #tpu.memory_space<vmem>>, vector<32x32xf32>
    %4 = vector.extract_strided_slice %2 {offsets = [0, 0], sizes = [32, 128], strides = [1, 1]} : vector<32x640xf32> to vector<32x128xf32>
    %5 = arith.negf %4 : vector<32x128xf32>
    %6 = math.exp %5 : vector<32x128xf32>
    %cst_5 = arith.constant 1.000000e+00 : f32
    %7 = vector.broadcast %cst_5 : f32 to vector<32x128xf32>
    %8 = arith.addf %7, %6 : vector<32x128xf32>
    %9 = arith.divf %7, %8 : vector<32x128xf32>
    %10 = vector.extract_strided_slice %2 {offsets = [0, 128], sizes = [32, 128], strides = [1, 1]} : vector<32x640xf32> to vector<32x128xf32>
    %11 = arith.negf %10 : vector<32x128xf32>
    %12 = math.exp %11 : vector<32x128xf32>
    %cst_6 = arith.constant 1.000000e+00 : f32
    %13 = vector.broadcast %cst_6 : f32 to vector<32x128xf32>
    %14 = arith.addf %13, %12 : vector<32x128xf32>
    %15 = arith.divf %13, %14 : vector<32x128xf32>
    %16 = vector.extract_strided_slice %2 {offsets = [0, 256], sizes = [32, 128], strides = [1, 1]} : vector<32x640xf32> to vector<32x128xf32>
    %17 = math.tanh %16 : vector<32x128xf32>
    %18 = vector.extract_strided_slice %2 {offsets = [0, 384], sizes = [32, 128], strides = [1, 1]} : vector<32x640xf32> to vector<32x128xf32>
    %19 = arith.negf %18 : vector<32x128xf32>
    %20 = math.exp %19 : vector<32x128xf32>
    %cst_7 = arith.constant 1.000000e+00 : f32
    %21 = vector.broadcast %cst_7 : f32 to vector<32x128xf32>
    %22 = arith.addf %21, %20 : vector<32x128xf32>
    %23 = arith.divf %21, %22 : vector<32x128xf32>
    %24 = vector.extract_strided_slice %2 {offsets = [0, 512], sizes = [32, 128], strides = [1, 1]} : vector<32x640xf32> to vector<32x128xf32>
    %25 = tpu.concatenate %3, %3, %3, %3 in 1 : vector<32x32xf32>, vector<32x32xf32>, vector<32x32xf32>, vector<32x32xf32> -> vector<32x128xf32>
    %26 = arith.mulf %15, %25 : vector<32x128xf32>
    %27 = arith.mulf %9, %17 : vector<32x128xf32>
    %28 = arith.addf %26, %27 : vector<32x128xf32>
    %29 = math.tanh %28 : vector<32x128xf32>
    %30 = arith.mulf %23, %29 : vector<32x128xf32>
    %31 = arith.mulf %30, %24 : vector<32x128xf32>
    %32 = vector.extract_strided_slice %31 {offsets = [0, 0], sizes = [32, 32], strides = [1, 1]} : vector<32x128xf32> to vector<32x32xf32>
    %cst_8 = arith.constant dense<0.000000e+00> : vector<32xf32>
    %33 = vector.multi_reduction <add>, %32, %cst_8 [1] : vector<32x32xf32> to vector<32xf32>
    %34 = vector.shape_cast %33 : vector<32xf32> to vector<32x1xf32>
    %35 = vector.extract_strided_slice %31 {offsets = [0, 32], sizes = [32, 32], strides = [1, 1]} : vector<32x128xf32> to vector<32x32xf32>
    %cst_9 = arith.constant dense<0.000000e+00> : vector<32xf32>
    %36 = vector.multi_reduction <add>, %35, %cst_9 [1] : vector<32x32xf32> to vector<32xf32>
    %37 = vector.shape_cast %36 : vector<32xf32> to vector<32x1xf32>
    %38 = vector.extract_strided_slice %31 {offsets = [0, 64], sizes = [32, 32], strides = [1, 1]} : vector<32x128xf32> to vector<32x32xf32>
    %cst_10 = arith.constant dense<0.000000e+00> : vector<32xf32>
    %39 = vector.multi_reduction <add>, %38, %cst_10 [1] : vector<32x32xf32> to vector<32xf32>
    %40 = vector.shape_cast %39 : vector<32xf32> to vector<32x1xf32>
    %41 = vector.extract_strided_slice %31 {offsets = [0, 96], sizes = [32, 32], strides = [1, 1]} : vector<32x128xf32> to vector<32x32xf32>
    %cst_11 = arith.constant dense<0.000000e+00> : vector<32xf32>
    %42 = vector.multi_reduction <add>, %41, %cst_11 [1] : vector<32x32xf32> to vector<32xf32>
    %43 = vector.shape_cast %42 : vector<32xf32> to vector<32x1xf32>
    %44 = tpu.concatenate %34, %37, %40, %43 in 1 : vector<32x1xf32>, vector<32x1xf32>, vector<32x1xf32>, vector<32x1xf32> -> vector<32x4xf32>
    %cst_12 = arith.constant dense<0xFF800000> : vector<32xf32>
    %45 = vector.multi_reduction <maximumf>, %44, %cst_12 [1] : vector<32x4xf32> to vector<32xf32>
    %46 = vector.shape_cast %45 : vector<32xf32> to vector<32x1xf32>
    %47 = vector.broadcast %46 : vector<32x1xf32> to vector<32x4xf32>
    %48 = arith.subf %44, %47 : vector<32x4xf32>
    %49 = math.exp %48 : vector<32x4xf32>
    %cst_13 = arith.constant dense<0.000000e+00> : vector<32xf32>
    %50 = vector.multi_reduction <add>, %49, %cst_13 [1] : vector<32x4xf32> to vector<32xf32>
    %51 = vector.shape_cast %50 : vector<32xf32> to vector<32x1xf32>
    %52 = vector.broadcast %51 : vector<32x1xf32> to vector<32x4xf32>
    %53 = arith.divf %49, %52 : vector<32x4xf32>
    %cst_14 = arith.constant 0.000000e+00 : f32
    %54 = vector.broadcast %cst_14 : f32 to vector<32x32xf32>
    %cst_15 = arith.constant 0.000000e+00 : f32
    %55 = vector.broadcast %cst_15 : f32 to vector<32x32xf32>
    %56 = vector.extract_strided_slice %53 {offsets = [0, 0], sizes = [32, 1], strides = [1, 1]} : vector<32x4xf32> to vector<32x1xf32>
    %57 = vector.extract_strided_slice %30 {offsets = [0, 0], sizes = [32, 32], strides = [1, 1]} : vector<32x128xf32> to vector<32x32xf32>
    %58 = vector.broadcast %56 : vector<32x1xf32> to vector<32x32xf32>
    %59 = arith.mulf %58, %57 : vector<32x32xf32>
    %60 = arith.addf %54, %59 : vector<32x32xf32>
    %61 = vector.extract_strided_slice %28 {offsets = [0, 0], sizes = [32, 32], strides = [1, 1]} : vector<32x128xf32> to vector<32x32xf32>
    %62 = vector.broadcast %56 : vector<32x1xf32> to vector<32x32xf32>
    %63 = arith.mulf %62, %61 : vector<32x32xf32>
    %64 = arith.addf %55, %63 : vector<32x32xf32>
    %65 = vector.extract_strided_slice %53 {offsets = [0, 1], sizes = [32, 1], strides = [1, 1]} : vector<32x4xf32> to vector<32x1xf32>
    %66 = vector.extract_strided_slice %30 {offsets = [0, 32], sizes = [32, 32], strides = [1, 1]} : vector<32x128xf32> to vector<32x32xf32>
    %67 = vector.broadcast %65 : vector<32x1xf32> to vector<32x32xf32>
    %68 = arith.mulf %67, %66 : vector<32x32xf32>
    %69 = arith.addf %60, %68 : vector<32x32xf32>
    %70 = vector.extract_strided_slice %28 {offsets = [0, 32], sizes = [32, 32], strides = [1, 1]} : vector<32x128xf32> to vector<32x32xf32>
    %71 = vector.broadcast %65 : vector<32x1xf32> to vector<32x32xf32>
    %72 = arith.mulf %71, %70 : vector<32x32xf32>
    %73 = arith.addf %64, %72 : vector<32x32xf32>
    %74 = vector.extract_strided_slice %53 {offsets = [0, 2], sizes = [32, 1], strides = [1, 1]} : vector<32x4xf32> to vector<32x1xf32>
    %75 = vector.extract_strided_slice %30 {offsets = [0, 64], sizes = [32, 32], strides = [1, 1]} : vector<32x128xf32> to vector<32x32xf32>
    %76 = vector.broadcast %74 : vector<32x1xf32> to vector<32x32xf32>
    %77 = arith.mulf %76, %75 : vector<32x32xf32>
    %78 = arith.addf %69, %77 : vector<32x32xf32>
    %79 = vector.extract_strided_slice %28 {offsets = [0, 64], sizes = [32, 32], strides = [1, 1]} : vector<32x128xf32> to vector<32x32xf32>
    %80 = vector.broadcast %74 : vector<32x1xf32> to vector<32x32xf32>
    %81 = arith.mulf %80, %79 : vector<32x32xf32>
    %82 = arith.addf %73, %81 : vector<32x32xf32>
    %83 = vector.extract_strided_slice %53 {offsets = [0, 3], sizes = [32, 1], strides = [1, 1]} : vector<32x4xf32> to vector<32x1xf32>
    %84 = vector.extract_strided_slice %30 {offsets = [0, 96], sizes = [32, 32], strides = [1, 1]} : vector<32x128xf32> to vector<32x32xf32>
    %85 = vector.broadcast %83 : vector<32x1xf32> to vector<32x32xf32>
    %86 = arith.mulf %85, %84 : vector<32x32xf32>
    %87 = arith.addf %78, %86 : vector<32x32xf32>
    %88 = vector.extract_strided_slice %28 {offsets = [0, 96], sizes = [32, 32], strides = [1, 1]} : vector<32x128xf32> to vector<32x32xf32>
    %89 = vector.broadcast %83 : vector<32x1xf32> to vector<32x32xf32>
    %90 = arith.mulf %89, %88 : vector<32x32xf32>
    %91 = arith.addf %82, %90 : vector<32x32xf32>
    %c0_16 = arith.constant 0 : index
    %c0_17 = arith.constant 0 : index
    %92 = vector.load %arg4[%c0_16, %c0_17] : memref<32x32xf32, #tpu.memory_space<vmem>>, vector<32x32xf32>
    tpu.vector_store %arg4[%c0_16, %c0_17], %87 {strides = array<i32>} : memref<32x32xf32, #tpu.memory_space<vmem>>, vector<32x32xf32>,
    %c0_18 = arith.constant 0 : index
    %c0_19 = arith.constant 0 : index
    %93 = vector.load %arg5[%c0_18, %c0_19] : memref<32x32xf32, #tpu.memory_space<vmem>>, vector<32x32xf32>
    tpu.vector_store %arg5[%c0_18, %c0_19], %91 {strides = array<i32>} : memref<32x32xf32, #tpu.memory_space<vmem>>, vector<32x32xf32>,
    %c0_20 = arith.constant 0 : index
    %c0_21 = arith.constant 0 : index
    %94 = vector.load %arg6[%c0_20, %c0_21] : memref<32x4xf32, #tpu.memory_space<vmem>>, vector<32x4xf32>
    tpu.vector_store %arg6[%c0_20, %c0_21], %53 {strides = array<i32>} : memref<32x4xf32, #tpu.memory_space<vmem>>, vector<32x4xf32>,
    return
  }
  func.func @transform_0(%arg0: i32) -> (i32, i32) {
    %c0_i32 = arith.constant 0 : i32
    %c0_i32_0 = arith.constant 0 : i32
    return %arg0, %c0_i32 : i32, i32
  }
  func.func @transform_1(%arg0: i32) -> (i32, i32) {
    %c0_i32 = arith.constant 0 : i32
    %c0_i32_0 = arith.constant 0 : i32
    return %arg0, %c0_i32 : i32, i32
  }
  func.func @transform_2(%arg0: i32) -> (i32, i32) {
    %c0_i32 = arith.constant 0 : i32
    %c0_i32_0 = arith.constant 0 : i32
    %c0_i32_1 = arith.constant 0 : i32
    return %c0_i32, %c0_i32_0 : i32, i32
  }
  func.func @transform_3(%arg0: i32) -> (i32, i32) {
    %c0_i32 = arith.constant 0 : i32
    %c0_i32_0 = arith.constant 0 : i32
    return %arg0, %c0_i32 : i32, i32
  }
  func.func @transform_4(%arg0: i32) -> (i32, i32) {
    %c0_i32 = arith.constant 0 : i32
    %c0_i32_0 = arith.constant 0 : i32
    return %arg0, %c0_i32 : i32, i32
  }
  func.func @transform_5(%arg0: i32) -> (i32, i32) {
    %c0_i32 = arith.constant 0 : i32
    %c0_i32_0 = arith.constant 0 : i32
    return %arg0, %c0_i32 : i32, i32
  }
}

</mosaic_0001>

<bundles_post_ra>
// kernel: tpu_custom_call.1
= control target key start
LH: loop header
LB: loop body
LE: loop exit
PB: predicated region body
PF: predicated region fallthrough
CT: control target
= control target key end

     0   :  { %11 = vsyncpa [#allocation3], 0  ;;  %s1646_s18 = smov 0   ;;  %s1989_s0 = inlined_call_operand.vmem [shape: f32[64,49], index: 0, kind: input, shape index: {}]   ;;  %s1990_s1 = inlined_call_operand.vmem [shape: f32[64,32], index: 1, kind: input, shape index: {}]   ;;  %s1991_s2 = inlined_call_operand.hbm [shape: f32[49,640], index: 2, kind: input, shape index: {}]   ;;  %s1992_s3 = inlined_call_operand.vmem [shape: f32[64,32], index: 3, kind: output, shape index: {0}]   ;;  %s1993_s4 = inlined_call_operand.vmem [shape: f32[64,32], index: 4, kind: output, shape index: {1}]   ;;  %s1994_s5 = inlined_call_operand.vmem [shape: f32[64,4], index: 5, kind: output, shape index: {2}]  }
   0x1 LB: > { %s1318_s19 = sadd.s32 4294967295, %s1603_s18   ;;  %p1320_p0 = scmp.ge.s32.totalorder %s1603_s18, 1  ;;  %s1603_s18 = sphi %s1646_s18, %s17_s18  }
   0x2   : > { %p173_p1 = scmp.lt.s32.totalorder %s1603_s18, 3  ;;  %s1605_s20 = smov [#allocation2]  }
   0x3   : > { %s185_s21 = sshll.u32 %s1605_s20, 4  ;;  %p1660_p3 = scmp.eq.s32.totalorder %s1318_s19, 0  ;;  %s186_s21 = int_to_ptr.vmem [resolvable:$true] %s185_s21 }
   0x4   : > { %p1654_p2 = pnand %p1320_p0, %p173_p1  ;;  %s1565_s27 = scalar_lea.hbm %s1991_s2, 4480 }
   0x5   : > { %s1999_s23 = scalar_select %p1660_p3, 1, 0 }
   0x6   : > { %s1998_s22 = scalar_select %p1654_p2, 1, 0 }
   0x7   : > { %p1445_p4 = pneg %p1654_p2  ;;  %p1566_p6 = scmp.ne.s32.totalorder %s1991_s2, %s1565_s27 }
   0x8   : > { %p1572_p10 = scmp.lt.u32.totalorder %s1565_s27, %s1991_s2 }
   0x9   : > { %p1668_p5 = pnand %p1660_p3, %p1445_p4 }
   0xb   : > { %p1567_p7 = pneg %p1668_p5 }
   0xd   : > { %p1568_p8 = pnand %p1567_p7, %p1566_p6 }
   0xf   : > { %p1569_p9 = pneg %p1568_p8 }
  0x11   : > { %p1574_p11 = pnand %p1572_p10, %p1569_p9 }
  0x13   : > { %1577 = shalt.err (!%p1574_p11)
}
  0x14   : > { %s1578_s7 = scalar_lea.vmem %s186_s21, 4480  ;;  %p1586_p1 = scmp.lt.s32.totalorder %s186_s21, %s186_s21 }
  0x15   : > { %p1579_p12 = scmp.ne.s32.totalorder %s186_s21, %s1578_s7  ;;  %p1587_p4 = scmp.lt.s32.totalorder %s1578_s7, %s1578_s7 }
  0x17   : > { %p1581_p13 = pnand %p1579_p12, %p1567_p7  ;;  %p1588_p3 = por %p1587_p4, %p1586_p1 }
  0x19   : > { %p1582_p0 = pneg %p1581_p13 }
  0x1b   : > { %p1589_p2 = pnand %p1588_p3, %p1582_p0 }
  0x1d   : > { %1592 = shalt.err (!%p1589_p2)
}
  0x1e   : > { %s1606_s8 = smov 640   ;;  %s1607_s9 = smov 40  }
  0x1f   : > { %1448 = dma.hbm_to_vmem [thread:$0]  (!%p1668_p5), %s1991_s2, 4480, %s186_s21, [#allocation3], %s1606_s8, %s1606_s8, %s1607_s9  }
  0x20   : > { %p2001_p6 = scmp.ne.s32.totalorder %s1998_s22, 0 }
  0x21   : > { %p2002_p8 = scmp.ne.s32.totalorder (!%p2001_p6), %s1999_s23, 0 }
  0x22   : > { %219 = sbr.rel (%p2001_p6) target bundleno = 1210 (0x4ba), region = 32 }
  0x29   : > { %1598 = dma.done.wait (%p2002_p8), [#allocation3], 4480  }
  0x2a   : > { %1600 = vsyncadd (%p2002_p8), [#allocation3], 4294962816  ;;  %v1608_v0 = vmov 0.0   ;;  %s1325_s12 = sshll.u32 %s1318_s19, 2  ;;  %v297_v1 = vld [vmem:[#allocation2 + $0x8] sm:$0xff]  ;;  %v302_v2 = vld [vmem:[#allocation2 + $0x30] sm:$0xff] }
  0x2b   : > { %424 = vmatprep.mubr.f32.mxu0 %v1608_v0  ;;  %513 = vmatprep.mubr.f32.mxu1 %v1608_v0  ;;  %v296_v3 = vld [vmem:[#allocation2] sm:$0xff]  ;;  %p263_p2 = scmp.lt.s32.totalorder %s1325_s12, 7  ;;  %v1397_v4 = vpack.c.bf16 %v302_v2, %v297_v1  ;;  %v301_v5 = vld [vmem:[#allocation2 + $0x28] sm:$0xff]  ;;  %v307_v6 = vld [vmem:[#allocation2 + $0x58] sm:$0xff]  ;;  %vm344_vm0 = vcmask 1040384   ;;  %vm331_vm1 = vcmask 400384  }
  0x2c   : > { %v312_v7 = vld [vmem:[#allocation2 + $0x80] sm:$0xff]  ;;  %v1399_v8 = vpack.c.bf16 %v301_v5, %v296_v3  ;;  %v306_v10 = vld [vmem:[#allocation2 + $0x50] sm:$0xff]  ;;  %v311_v11 = vld [vmem:[#allocation2 + $0x78] sm:$0xff]  ;;  %s1609_s21 = smov 32   ;;  %s1610_s22 = smov 64   ;;  %vm743_vm2 = vcmask 261120  }
  0x2d   : > { %v1401_v9 = vpack.c.bf16 %v312_v7, %v307_v6  ;;  %v317_v12 = vld [vmem:[#allocation2 + $0xa8] sm:$0xff]  ;;  %1398 = vmatprep.subr.bf16.mxu0 %v1397_v4  ;;  %v322_v13 = vld [vmem:[#allocation2 + $0xd0] sm:$0xff]  ;;  %v1403_v14 = vpack.c.bf16 %v311_v11, %v306_v10  ;;  %v316_v15 = vld [vmem:[#allocation2 + $0xa0] sm:$0xff]  ;;  %s2004_s12 = smov (!%p263_p2, %s1325_s12), 7  ;;  %s1611_s23 = smov 96   ;;  %vm748_vm3 = vcmask 523264  }
  0x2e   : > { %1400 = vmatpush1.bf16.msra.mxu0 %v1399_v8  ;;  %v321_v16 = vld [vmem:[#allocation2 + $0xc8] sm:$0xff]  ;;  %v1405_v17 = vpack.c.bf16 %v322_v13, %v317_v12  ;;  %v299_v18 = vld [vmem:[#allocation2 + $0x18] sm:$0xff]  ;;  %v304_v19 = vld [vmem:[#allocation2 + $0x40] sm:$0xff]  ;;  %s1699_s13 = sshll.u32 %s2004_s12, 3  ;;  %vm753_vm4 = vcmask 785408   ;;  %vm870_vm5 = vcmask 7168  }
  0x2f   : > { %1402 = vmatprep.subr.bf16.mxu0 %v1401_v9  ;;  %v298_v20 = vld [vmem:[#allocation2 + $0x10] sm:$0xff]  ;;  %v1409_v21 = vpack.c.bf16 %v304_v19, %v299_v18  ;;  %v303_v22 = vld [vmem:[#allocation2 + $0x38] sm:$0xff]  ;;  %v309_v23 = vld [vmem:[#allocation2 + $0x68] sm:$0xff]  ;;  %v1407_v28 = vpack.c.bf16 %v321_v16, %v316_v15  ;;  %s1705_s16 = scalar_lea.vmem %s1990_s1, %s1699_s13  ;;  %s1711_s20 = scalar_lea.vmem %s1989_s0, %s1699_s13  ;;  %vm875_vm6 = vcmask 15360   ;;  %vm880_vm7 = vcmask 23552  }
  0x30   : > { %v1411_v24 = vpack.c.bf16 %v303_v22, %v298_v20  ;;  %v314_v25 = vld [vmem:[#allocation2 + $0x90] sm:$0xff]  ;;  %v308_v26 = vld [vmem:[#allocation2 + $0x60] sm:$0xff]  ;;  %v313_v27 = vld [vmem:[#allocation2 + $0x88] sm:$0xff]  ;;  %vm885_vm8 = vcmask 31744   ;;  %s290_s26 = scalar_lea.vmem %s1994_s5, %s1699_s13  ;;  %s1952_s29 = scalar_lea.vmem %s1992_s3, %s1699_s13 }
  0x31   : > { %1410 = vmatprep.subr.bf16.mxu1 %v1409_v21  ;;  %v1413_v29 = vpack.c.bf16 %v314_v25, %v309_v23  ;;  %v319_v30 = vld [vmem:[#allocation2 + $0xb8] sm:$0xff]  ;;  %v324_v31 = vld [vmem:[#allocation2 + $0xe0] sm:$0xff]  ;;  %v1415_v32 = vpack.c.bf16 %v313_v27, %v308_v26  ;;  %v318_v35 = vld [vmem:[#allocation2 + $0xb0] sm:$0xff]  ;;  %s1961_s7 = scalar_lea.vmem %s1993_s4, %s1699_s13 }
  0x32   : > { %1404 = vmatpush1.bf16.msra.mxu0 %v1403_v14  ;;  %1412 = vmatpush1.bf16.msra.mxu1 %v1411_v24  ;;  %v327_v33 = vld [vmem:[#allocation2 + $0xf8] sm:$0x1]  ;;  %v1417_v34 = vpack.c.bf16 %v324_v31, %v319_v30  ;;  %v300_v37 = vld [vmem:[#allocation2 + $0x20] sm:$0xff]  ;;  %v305_v38 = vld [vmem:[#allocation2 + $0x48] sm:$0xff] }
  0x33   : > { %1406 = vmatprep.subr.bf16.mxu0 %v1405_v17  ;;  %1414 = vmatprep.subr.bf16.mxu1 %v1413_v29  ;;  %v323_v36 = vld [vmem:[#allocation2 + $0xd8] sm:$0xff]  ;;  %v326_v39 = vld [vmem:[#allocation2 + $0xf0] sm:$0x1]  ;;  %v1715_v41 = vld [vmem:[%s1705_s16] sm:$0xff]  ;;  %v1421_v44 = vpack.c.bf16 %v305_v38, %v300_v37 }
  0x34   : > { %v1419_v40 = vpack.c.bf16 %v323_v36, %v318_v35  ;;  %v292_v42 = vld [vmem:[%s1711_s20] sm:$0xff]  ;;  %707 = vrot.lane.b32.xlu0 %v1715_v41, %s1609_s21  ;;  %v329_v43 = vld [vmem:[#allocation2 + $0x108] sm:$0x1]  ;;  %719 = vrot.lane.b32.xlu1 %v1715_v41, %s1610_s22  ;;  %v310_v45 = vld [vmem:[#allocation2 + $0x70] sm:$0xff] }
  0x35   : > { %v315_v46 = vld [vmem:[#allocation2 + $0x98] sm:$0xff]  ;;  %v1724_v47 = vld [vmem:[%s1705_s16 + $0x8] sm:$0xff]  ;;  %v1729_v49 = vld [vmem:[%s1705_s16 + $0x10] sm:$0xff] }
  0x36   : > { %1408 = vmatpush1.bf16.msra.mxu0 %v1407_v28  ;;  %1416 = vmatpush1.bf16.msra.mxu1 %v1415_v32  ;;  %v293_v48 = vld [vmem:[%s1711_s20 + $0x8] sm:$0xff]  ;;  %v328_v50 = vld [vmem:[#allocation2 + $0x100] sm:$0x1]  ;;  %v1425_v53 = vpack.c.bf16 %v315_v46, %v310_v45  ;;  %v294_v55 = vld [vmem:[%s1711_s20 + $0x10] sm:$0xff] }
  0x37   : > { %1335 = vmatprep.subr.msk.mxu0 %vm344_vm0, %v327_v33  ;;  %1418 = vmatprep.subr.bf16.mxu1 %v1417_v34  ;;  %v320_v51 = vld [vmem:[#allocation2 + $0xc0] sm:$0xff]  ;;  %v325_v52 = vld [vmem:[#allocation2 + $0xe8] sm:$0xff]  ;;  %v295_v56 = vld [vmem:[%s1711_s20 + $0x18] sm:$0xff] }
  0x38   : > { %709 = vrot.lane.b32.xlu0 %v1724_v47, %s1609_s21  ;;  %711 = vrot.lane.b32.xlu1 %v1729_v49, %s1609_s21  ;;  %v1429_v54 = vpack.c.bf16 %v325_v52, %v320_v51  ;;  %v330_v57 = vld [vmem:[#allocation2 + $0x110] sm:$0x1]  ;;  %v1759_v58 = vld [vmem:[%s1705_s16 + $0x18] sm:$0xff] }
  0x3a   : > { %1336 = vmatpush1.msk.msra.mxu0 %vm344_vm0, %v326_v39  ;;  %1420 = vmatpush1.bf16.msra.mxu1 %v1419_v40 }
  0x3b   : > { %1337 = vmatmul.mubr.msk.f32.vlgmr.msra.gmra.mrb[0].mxu0 %vm331_vm1, %v292_v42  ;;  %1341 = vmatprep.subr.msk.mxu1 %vm344_vm0, %v329_v43 }
  0x3c   : > { %430 = vmatprep.mubr.f32.mxu0 %v1608_v0  ;;  %1422 = vmatprep.subr.bf16.mxu0 %v1421_v44 }
  0x3d   : > { %1424 = vmatpush3.bf16.msra.mxu0 %v1421_v44  ;;  %721 = vrot.lane.b32.xlu0 %v1724_v47, %s1610_s22 }
  0x3e   : > { %1342 = vmatpush1.msk.msra.mxu1 %vm344_vm0, %v328_v50  ;;  %1426 = vmatprep.subr.bf16.mxu0 %v1425_v53 }
  0x3f   : > { %1338 = vmatmul.mubr.msk.f32.gmra.mrb[2].mxu0 %vm331_vm1, %v293_v48  ;;  %1343 = vmatmul.mubr.msk.f32.vlgmr.msra.gmra.mrb[0].mxu1 %vm331_vm1, %v292_v42 }
  0x40   : > { %436 = vmatprep.mubr.f32.mxu0 %v1608_v0  ;;  %519 = vmatprep.mubr.f32.mxu1 %v1608_v0 }
  0x41   : > { %1428 = vmatpush3.bf16.msra.mxu0 %v1425_v53  ;;  %1433 = vmatprep.subr.bf16.mxu1 %v1421_v44 }
  0x42   : > { %1430 = vmatprep.subr.bf16.mxu0 %v1429_v54  ;;  %1437 = vmatpush3.bf16.msra.mxu1 %v1421_v44 }
  0x43   : > { %1339 = vmatmul.mubr.msk.f32.gmra.mrb[4].mxu0 %vm331_vm1, %v294_v55  ;;  %1344 = vmatmul.mubr.msk.f32.gmra.mrb[2].mxu1 %vm331_vm1, %v293_v48 }
  0x44   : > { %442 = vmatprep.mubr.f32.mxu0 %v1608_v0  ;;  %525 = vmatprep.mubr.f32.mxu1 %v1608_v0 }
  0x45   : > { %1432 = vmatpush3.bf16.msra.mxu0 %v1429_v54  ;;  %1434 = vmatprep.subr.bf16.mxu1 %v1425_v53 }
  0x46   : > { %1389 = vmatprep.subr.msk.mxu0 %vm344_vm0, %v330_v57  ;;  %1438 = vmatpush3.bf16.msra.mxu1 %v1425_v53 }
  0x47   : > { %1340 = vmatmul.mubr.msk.f32.gmra.mrb[6].mxu0 %vm331_vm1, %v295_v56  ;;  %1345 = vmatmul.mubr.msk.f32.gmra.mrb[4].mxu1 %vm331_vm1, %v294_v55 }
  0x48   : > { %1391 = vmatprep.mubr.msk.f32.mxu0 %vm331_vm1, %v292_v42  ;;  %531 = vmatprep.mubr.f32.mxu1 %v1608_v0 }
  0x49   : > { %1390 = vmatpush3.msk.msra.mxu0 %vm344_vm0, %v330_v57  ;;  %1435 = vmatprep.subr.bf16.mxu1 %v1429_v54 }
  0x4a   : > { %731 = vrot.lane.b32.xlu1 %v1715_v41, %s1611_s23  ;;  %1439 = vmatpush3.bf16.msra.mxu1 %v1429_v54 }
  0x4b   : > { %1392 = vmatmul.mubr.msk.f32.vlgmr.msra.gmra.mrb[8].mxu0 %vm331_vm1, %v293_v48  ;;  %1346 = vmatmul.mubr.msk.f32.gmra.mrb[6].mxu1 %vm331_vm1, %v295_v56 }
  0x4c   : > { %1394 = vmatprep.mubr.msk.f32.mxu1 %vm331_vm1, %v294_v55  ;;  %1436 = vmatprep.subr.msk.mxu1 %vm344_vm0, %v330_v57 }
  0x4d   : > { %713 = vrot.lane.b32.xlu0 %v1759_v58, %s1609_s21 }
  0x4e   : > { %723 = vrot.lane.b32.xlu1 %v1729_v49, %s1610_s22  ;;  %1440 = vmatpush3.msk.msra.mxu1 %vm344_vm0, %v330_v57 }
  0x4f   : > { %1395 = vmatmul.mubr.msk.f32.vlgmr.msra.gmra.mrb[8].mxu1 %vm331_vm1, %v295_v56 }
  0x51   : > { %733 = vrot.lane.b32.xlu0 %v1724_v47, %s1611_s23 }
  0x52   : > { %725 = vrot.lane.b32.xlu1 %v1759_v58, %s1610_s22 }
  0x55   : > { %735 = vrot.lane.b32.xlu0 %v1729_v49, %s1611_s23 }
  0x56   : > { %737 = vrot.lane.b32.xlu1 %v1759_v58, %s1611_s23 }
  0xa6   : > { %v708_v63 = vpop.permute.xlu0 %707  ;;  %v720_v13 = vpop.permute.xlu1 %719 }
  0xa7   : > { %v744_v42 = vsel %vm743_vm2, %v1715_v41, %v708_v63 }
  0xa8   : > { %v749_v53 = vsel %vm748_vm3, %v744_v42, %v720_v13 }
  0xaa   : > { %v1779_v7 = vpop.permute.xlu0 %709  ;;  %v712_v28 = vpop.permute.xlu1 %711 }
  0xab   : > { %v745_v41 = vsel %vm743_vm2, %v1724_v47, %v1779_v7  ;;  %v746_v47 = vsel %vm743_vm2, %v1729_v49, %v712_v28 }
  0xaf   : > { %v722_v23 = vpop.permute.xlu0 %721 }
  0xbc   : > { %v732_v45 = vpop.permute.xlu1 %731 }
  0xbf   : > { %v714_v39 = vpop.permute.xlu0 %713 }
 0x10e   : > { %v426_v59 = vpop.f32.mrb[0].mxu0 }
 0x10f   : > { %v1352_v60 = vmul.f32 -1.442695, %v426_v59  ;;  %v428_v61 = vpop.f32.mrb[1].mxu0 }
 0x110   : > { %v1356_v62 = vmul.f32 -1.442695, %v428_v61 }
 0x111   : > { %1485 = vpow2.f32 %v1352_v60  ;;  %v734_v60 = vpop.permute.xlu0 %733 }
 0x112   : > { %1487 = vpow2.f32 %v1356_v62  ;;  %v432_v0 = vpop.f32.mrb[2].mxu0  ;;  %v515_v3 = vpop.f32.mrb[0].mxu1  ;;  %v754_v62 = vsel %vm753_vm4, %v749_v53, %v732_v45 }
 0x113   : > { %v1353_v1 = vmul.f32 -1.442695, %v432_v0  ;;  %v434_v2 = vpop.f32.mrb[3].mxu0  ;;  %v517_v5 = vpop.f32.mrb[1].mxu1 }
 0x114   : > { %v1357_v4 = vmul.f32 -1.442695, %v434_v2  ;;  %v1360_v6 = vmul.f32 -1.442695, %v517_v5 }
 0x115   : > { %1489 = vpow2.f32 %v1353_v1  ;;  %v750_v1 = vsel %vm748_vm3, %v745_v41, %v722_v23 }
 0x116   : > { %1491 = vpow2.f32 %v1357_v4  ;;  %v438_v8 = vpop.f32.mrb[4].mxu0  ;;  %v521_v11 = vpop.f32.mrb[2].mxu1 }
 0x117   : > { %v1354_v9 = vmul.f32 -1.442695, %v438_v8  ;;  %v440_v10 = vpop.f32.mrb[5].mxu0  ;;  %1493 = vtanh.f32 %v515_v3  ;;  %v523_v14 = vpop.f32.mrb[3].mxu1 }
 0x118   : > { %v1358_v12 = vmul.f32 -1.442695, %v440_v10  ;;  %1495 = vpow2.f32 %v1360_v6  ;;  %v1361_v15 = vmul.f32 -1.442695, %v523_v14  ;;  %v724_v3 = vpop.permute.xlu1 %723  ;;  %v755_v10 = vsel %vm753_vm4, %v750_v1, %v734_v60 }
 0x119   : > { %1497 = vpow2.f32 %v1354_v9  ;;  %v751_v14 = vsel %vm748_vm3, %v746_v47, %v724_v3 }
 0x11a   : > { %1499 = vpow2.f32 %v1358_v12  ;;  %v444_v16 = vpop.f32.mrb[6].mxu0  ;;  %v527_v20 = vpop.f32.mrb[4].mxu1 }
 0x11b   : > { %v1486_v17 = vpop.eup %1485  ;;  %v1355_v18 = vmul.f32 -1.442695, %v444_v16  ;;  %v446_v19 = vpop.f32.mrb[7].mxu0  ;;  %1501 = vtanh.f32 %v521_v11 }
 0x11c   : > { %v1488_v21 = vpop.eup %1487  ;;  %v639_v22 = vadd.f32 1.0, %v1486_v17  ;;  %v1359_v24 = vmul.f32 -1.442695, %v446_v19  ;;  %1503 = vpow2.f32 %v1361_v15  ;;  %v529_v25 = vpop.f32.mrb[5].mxu1 }
 0x11d   : > { %v663_v26 = vadd.f32 1.0, %v1488_v21  ;;  %1505 = vpow2.f32 %v1355_v18  ;;  %v1362_v27 = vmul.f32 -1.442695, %v529_v25  ;;  %v736_v15 = vpop.permute.xlu0 %735  ;;  %v726_v16 = vpop.permute.xlu1 %725 }
 0x11e   : > { %1507 = vrcp.f32 %v639_v22  ;;  %v1781_v29 = vpop.f32.mrb[8].mxu0  ;;  %v533_v31 = vpop.f32.mrb[6].mxu1  ;;  %v756_v21 = vsel %vm753_vm4, %v751_v14, %v736_v15 }
 0x11f   : > { %v1490_v30 = vpop.eup %1489  ;;  %1509 = vrcp.f32 %v663_v26  ;;  %v1783_v32 = vpop.f32.mrb[9].mxu0 }
 0x120   : > { %v1492_v33 = vpop.eup %1491  ;;  %v640_v34 = vadd.f32 1.0, %v1490_v30  ;;  %1511 = vpow2.f32 %v1359_v24  ;;  %v535_v35 = vpop.f32.mrb[7].mxu1 }
 0x121   : > { %v1494_v36 = vpop.eup %1493  ;;  %v664_v37 = vadd.f32 1.0, %v1492_v33  ;;  %1513 = vpow2.f32 %v1362_v27  ;;  %v1363_v50 = vmul.f32 -1.442695, %v535_v35  ;;  %v738_v30 = vpop.permute.xlu1 %737 }
 0x122   : > { %v1496_v38 = vpop.eup %1495  ;;  %1515 = vrcp.f32 %v640_v34  ;;  %v1787_v51 = vpop.f32.mrb[8].mxu1 }
 0x123   : > { %v1498_v40 = vpop.eup %1497  ;;  %1517 = vrcp.f32 %v664_v37  ;;  %v1790_v54 = vpop.f32.mrb[9].mxu1  ;;  %v691_v59 = vadd.f32 1.0, %v1496_v38 }
 0x124   : > { %v1500_v43 = vpop.eup %1499  ;;  %v641_v44 = vadd.f32 1.0, %v1498_v40  ;;  %1519 = vtanh.f32 %v527_v20  ;;  %v747_v20 = vsel %vm743_vm2, %v1759_v58, %v714_v39 }
 0x125   : > { %v1502_v46 = vpop.eup %1501  ;;  %v665_v48 = vadd.f32 1.0, %v1500_v43  ;;  %v752_v28 = vsel %vm748_vm3, %v747_v20, %v726_v16 }
 0x126   : > { %v1504_v52 = vpop.eup %1503  ;;  %1521 = vrcp.f32 %v641_v44  ;;  %v757_v35 = vsel %vm753_vm4, %v752_v28, %v738_v30 }
 0x127   : > { %v1506_v55 = vpop.eup %1505  ;;  %1523 = vrcp.f32 %v665_v48  ;;  %v692_v8 = vadd.f32 1.0, %v1504_v52 }
 0x128   : > { %v1508_v56 = vpop.eup %1507  ;;  %v642_v57 = vadd.f32 1.0, %v1506_v55  ;;  %1525 = vtanh.f32 %v533_v31 }
 0x129   : > { %v1510_v61 = vpop.eup %1509  ;;  %v762_v63 = vmul.f32 %v1508_v56, %v1494_v36  ;;  %1527 = vpow2.f32 %v1363_v50 }
 0x12a   : > { %v1512_v0 = vpop.eup %1511  ;;  %1529 = vrcp.f32 %v642_v57  ;;  %v758_v2 = vmul.f32 %v1510_v61, %v754_v62 }
 0x12b   : > { %v1514_v4 = vpop.eup %1513  ;;  %v666_v5 = vadd.f32 1.0, %v1512_v0  ;;  %1531 = vrcp.f32 %v691_v59 }
 0x12c   : > { %v1516_v6 = vpop.eup %1515  ;;  %v1799_v7 = vadd.f32 %v762_v63, %v758_v2  ;;  %v693_v18 = vadd.f32 1.0, %v1514_v4 }
 0x12d   : > { %v1518_v9 = vpop.eup %1517  ;;  %1533 = vrcp.f32 %v666_v5  ;;  %v763_v11 = vmul.f32 %v1516_v6, %v1502_v46 }
 0x12e   : > { %v1520_v12 = vpop.eup %1519  ;;  %1535 = vtanh.f32 %v1799_v7  ;;  %v759_v13 = vmul.f32 %v1518_v9, %v755_v10 }
 0x12f   : > { %1537 = vrcp.f32 %v692_v8 }
 0x130   : > { %v1522_v17 = vpop.eup %1521  ;;  %v1804_v49 = vadd.f32 %v763_v11, %v759_v13 }
 0x131   : > { %v1524_v19 = vpop.eup %1523  ;;  %v764_v22 = vmul.f32 %v1522_v17, %v1520_v12 }
 0x132   : > { %v1526_v23 = vpop.eup %1525  ;;  %1539 = vtanh.f32 %v1804_v49  ;;  %v760_v24 = vmul.f32 %v1524_v19, %v756_v21 }
 0x133   : > { %v1528_v25 = vpop.eup %1527  ;;  %1541 = vrcp.f32 %v693_v18 }
 0x134   : > { %v1530_v26 = vpop.eup %1529  ;;  %v1810_v27 = vadd.f32 %v764_v22, %v760_v24  ;;  %v694_v58 = vadd.f32 1.0, %v1528_v25 }
 0x135   : > { %v765_v31 = vmul.f32 %v1530_v26, %v1526_v23  ;;  %v1532_v33 = vpop.eup %1531 }
 0x136   : > { %1543 = vtanh.f32 %v1810_v27 }
 0x137   : > { %v1534_v34 = vpop.eup %1533  ;;  %1545 = vrcp.f32 %v694_v58 }
 0x138   : > { %v1536_v36 = vpop.eup %1535  ;;  %v761_v37 = vmul.f32 %v1534_v34, %v757_v35 }
 0x139   : > { %v1815_v38 = vmul.f32 %v1536_v36, %v1532_v33  ;;  %v1538_v39 = vpop.eup %1537 }
 0x13a   : > { %v1817_v40 = vadd.f32 %v765_v31, %v761_v37 }
 0x13b   : > { %v778_v42 = vmul.f32 %v1815_v38, %v1783_v32 }
 0x13c   : > { %v1540_v43 = vpop.eup %1539  ;;  %1547 = vtanh.f32 %v1817_v40 }
 0x13d   : > { %v1822_v44 = vmul.f32 %v1540_v43, %v1538_v39  ;;  %846 = vrot.lane.b32.xlu1 %v778_v42, %s1609_s21  ;;  %798 = vrot.lane.b32.xlu0 %v778_v42, %s1611_s23  ;;  %v1542_v45 = vpop.eup %1541 }
 0x13f   : > { %v779_v46 = vmul.f32 %v1781_v29, %v1822_v44 }
 0x140   : > { %v1544_v48 = vpop.eup %1543 }
 0x141   : > { %800 = vrot.lane.b32.xlu1 %v779_v46, %s1611_s23  ;;  %822 = vrot.lane.b32.xlu0 %v778_v42, %s1610_s22  ;;  %v1830_v50 = vmul.f32 %v1544_v48, %v1542_v45  ;;  %v1546_v52 = vpop.eup %1545  ;;  %v785_v41 = vsel %vm743_vm2, %v779_v46, 0.0 }
 0x143   : > { %v780_v32 = vmul.f32 %v1830_v50, %v1790_v54  ;;  %v782_v54 = vsel %vm743_vm2, %v778_v42, 0.0 }
 0x145   : > { %802 = vrot.lane.b32.xlu1 %v780_v32, %s1611_s23  ;;  %824 = vrot.lane.b32.xlu0 %v779_v46, %s1610_s22  ;;  %v788_v56 = vsel %vm743_vm2, %v780_v32, 0.0 }
 0x146   : > { %v1548_v53 = vpop.eup %1547 }
 0x147   : > { %v1836_v55 = vmul.f32 %v1548_v53, %v1546_v52 }
 0x149   : > { %826 = vrot.lane.b32.xlu1 %v780_v32, %s1610_s22  ;;  %848 = vrot.lane.b32.xlu0 %v779_v46, %s1609_s21  ;;  %v781_v29 = vmul.f32 %v1787_v51, %v1836_v55 }
 0x14b   : > { %v791_v57 = vsel %vm743_vm2, %v781_v29, 0.0 }
 0x14d   : > { %828 = vrot.lane.b32.xlu1 %v781_v29, %s1610_s22  ;;  %804 = vrot.lane.b32.xlu0 %v781_v29, %s1611_s23 }
 0x151   : > { %852 = vrot.lane.b32.xlu1 %v781_v29, %s1609_s21  ;;  %850 = vrot.lane.b32.xlu0 %v780_v32, %s1609_s21 }
 0x170   : > { %783 = vadd.xlane.f32.xlu0 %v782_v54 }
 0x174   : > { %786 = vadd.xlane.f32.xlu0 %v785_v41 }
 0x178   : > { %789 = vadd.xlane.f32.xlu0 %v788_v56 }
 0x17c   : > { %792 = vadd.xlane.f32.xlu0 %v791_v57 }
 0x1af   : > { %v847_v51 = vpop.permute.xlu1 %846  ;;  %v799_v59 = vpop.permute.xlu0 %798 }
 0x1b0   : > { %v810_v60 = vsel %vm743_vm2, %v799_v59, 0.0  ;;  %v858_v3 = vsel %vm743_vm2, %v847_v51, 0.0 }
 0x1b1   : > { %811 = vadd.xlane.f32.xlu1 %v810_v60 }
 0x1b3   : > { %v801_v61 = vpop.permute.xlu1 %800  ;;  %v823_v62 = vpop.permute.xlu0 %822 }
 0x1b4   : > { %v834_v63 = vsel %vm743_vm2, %v823_v62, 0.0  ;;  %v813_v0 = vsel %vm743_vm2, %v801_v61, 0.0 }
 0x1b5   : > { %835 = vadd.xlane.f32.xlu1 %v834_v63  ;;  %814 = vadd.xlane.f32.xlu0 %v813_v0 }
 0x1b7   : > { %v803_v1 = vpop.permute.xlu1 %802  ;;  %v825_v2 = vpop.permute.xlu0 %824 }
 0x1b8   : > { %v837_v4 = vsel %vm743_vm2, %v825_v2, 0.0  ;;  %v816_v11 = vsel %vm743_vm2, %v803_v1, 0.0 }
 0x1b9   : > { %859 = vadd.xlane.f32.xlu1 %v858_v3  ;;  %838 = vadd.xlane.f32.xlu0 %v837_v4 }
 0x1bb   : > { %v827_v5 = vpop.permute.xlu1 %826  ;;  %v849_v47 = vpop.permute.xlu0 %848 }
 0x1bc   : > { %v861_v6 = vsel %vm743_vm2, %v849_v47, 0.0  ;;  %v840_v8 = vsel %vm743_vm2, %v827_v5, 0.0 }
 0x1bd   : > { %862 = vadd.xlane.f32.xlu1 %v861_v6  ;;  %841 = vadd.xlane.f32.xlu0 %v840_v8 }
 0x1bf   : > { %v829_v9 = vpop.permute.xlu1 %828  ;;  %v805_v10 = vpop.permute.xlu0 %804 }
 0x1c0   : > { %v843_v12 = vsel %vm743_vm2, %v829_v9, 0.0  ;;  %v819_v14 = vsel %vm743_vm2, %v805_v10, 0.0 }
 0x1c1   : > { %817 = vadd.xlane.f32.xlu1 %v816_v11  ;;  %844 = vadd.xlane.f32.xlu0 %v843_v12 }
 0x1c3   : > { %v853_v13 = vpop.permute.xlu1 %852  ;;  %v851_v16 = vpop.permute.xlu0 %850 }
 0x1c4   : > { %v867_v15 = vsel %vm743_vm2, %v853_v13, 0.0  ;;  %v864_v17 = vsel %vm743_vm2, %v851_v16, 0.0 }
 0x1c5   : > { %820 = vadd.xlane.f32.xlu1 %v819_v14  ;;  %868 = vadd.xlane.f32.xlu0 %v867_v15  ;;  %v1612_v14 = vmov 2   ;;  %v1613_v15 = vmov 0  }
 0x1c6   : > { %1472 = vset.pattern.permute.xlu0 %v1612_v14  ;;  %1470 = vset.pattern.permute.xlu1 %v1613_v15 }
 0x1c9   : > { %865 = vadd.xlane.f32.xlu1 %v864_v17 }
 0x1fd   : > { %v784_v18 = vpop.xlane.xlu0 %783 }
 0x201   : > { %v787_v19 = vpop.xlane.xlu0 %786 }
 0x205   : > { %v790_v20 = vpop.xlane.xlu0 %789 }
 0x209   : > { %v793_v21 = vpop.xlane.xlu0 %792 }
 0x23e   : > { %v812_v22 = vpop.xlane.xlu1 %811 }
 0x23f   : > { %v871_v25 = vsel %vm870_vm5, %v784_v18, %v812_v22 }
 0x242   : > { %v836_v23 = vpop.xlane.xlu1 %835  ;;  %v815_v24 = vpop.xlane.xlu0 %814 }
 0x243   : > { %v876_v26 = vsel %vm875_vm6, %v871_v25, %v836_v23  ;;  %v872_v58 = vsel %vm870_vm5, %v787_v19, %v815_v24  ;;  %v1614_v24 = vmov 1   ;;  %v1615_v25 = vmov 3  }
 0x246   : > { %v860_v28 = vpop.xlane.xlu1 %859  ;;  %v839_v30 = vpop.xlane.xlu0 %838 }
 0x247   : > { %v881_v31 = vsel %vm880_vm7, %v876_v26, %v860_v28  ;;  %v877_v34 = vsel %vm875_vm6, %v872_v58, %v839_v30 }
 0x248   : > { %v886_v33 = vsel %vm885_vm8, %v881_v31, -inf }
 0x249   : > { %887 = vmax.xlane.f32.xlu1 %v886_v33 }
 0x24a   : > { %v863_v35 = vpop.xlane.xlu1 %862  ;;  %v842_v36 = vpop.xlane.xlu0 %841 }
 0x24b   : > { %v882_v37 = vsel %vm880_vm7, %v877_v34, %v863_v35 }
 0x24c   : > { %v889_v39 = vsel %vm885_vm8, %v882_v37, -inf }
 0x24d   : > { %890 = vmax.xlane.f32.xlu0 %v889_v39 }
 0x24e   : > { %v818_v42 = vpop.xlane.xlu1 %817  ;;  %v845_v43 = vpop.xlane.xlu0 %844 }
 0x24f   : > { %v873_v46 = vsel %vm870_vm5, %v790_v20, %v818_v42 }
 0x250   : > { %v878_v41 = vsel %vm875_vm6, %v873_v46, %v842_v36 }
 0x252   : > { %v821_v45 = vpop.xlane.xlu1 %820  ;;  %v869_v32 = vpop.xlane.xlu0 %868 }
 0x253   : > { %v874_v48 = vsel %vm870_vm5, %v793_v21, %v821_v45 }
 0x254   : > { %v879_v52 = vsel %vm875_vm6, %v874_v48, %v845_v43 }
 0x255   : > { %v884_v53 = vsel %vm880_vm7, %v879_v52, %v869_v32 }
 0x256   : > { %v866_v29 = vpop.xlane.xlu1 %865  ;;  %v895_v54 = vsel %vm885_vm8, %v884_v53, -inf }
 0x257   : > { %896 = vmax.xlane.f32.xlu0 %v895_v54  ;;  %v883_v56 = vsel %vm880_vm7, %v878_v41, %v866_v29 }
 0x258   : > { %v892_v57 = vsel %vm885_vm8, %v883_v56, -inf }
 0x259   : > { %893 = vmax.xlane.f32.xlu1 %v892_v57 }
 0x2d6   : > { %v888_v51 = vpop.xlane.xlu1 %887 }
 0x2d7   : > { %v898_v59 = vsub.f32 %v881_v31, %v888_v51 }
 0x2d9   : > { %v902_v60 = vmul.f32 1.442695, %v898_v59 }
 0x2da   : > { %v891_v61 = vpop.xlane.xlu0 %890 }
 0x2db   : > { %1549 = vpow2.f32 %v902_v60  ;;  %v899_v62 = vsub.f32 %v882_v37, %v891_v61 }
 0x2dd   : > { %v904_v63 = vmul.f32 1.442695, %v899_v62 }
 0x2df   : > { %1551 = vpow2.f32 %v904_v63 }
 0x2e4   : > { %v897_v0 = vpop.xlane.xlu0 %896 }
 0x2e5   : > { %v1550_v1 = vpop.eup %1549  ;;  %v901_v2 = vsub.f32 %v884_v53, %v897_v0 }
 0x2e6   : > { %v894_v3 = vpop.xlane.xlu1 %893  ;;  %v910_v4 = vsel %vm885_vm8, %v1550_v1, 0.0 }
 0x2e7   : > { %v908_v5 = vmul.f32 1.442695, %v901_v2  ;;  %v900_v47 = vsub.f32 %v883_v56, %v894_v3  ;;  %911 = vadd.xlane.f32.xlu1 %v910_v4 }
 0x2e9   : > { %v1552_v6 = vpop.eup %1551  ;;  %1553 = vpow2.f32 %v908_v5  ;;  %v906_v8 = vmul.f32 1.442695, %v900_v47 }
 0x2ea   : > { %v913_v9 = vsel %vm885_vm8, %v1552_v6, 0.0 }
 0x2eb   : > { %1555 = vpow2.f32 %v906_v8  ;;  %914 = vadd.xlane.f32.xlu0 %v913_v9 }
 0x2f3   : > { %v1554_v10 = vpop.eup %1553 }
 0x2f4   : > { %v919_v11 = vsel %vm885_vm8, %v1554_v10, 0.0 }
 0x2f5   : > { %v1556_v12 = vpop.eup %1555  ;;  %920 = vadd.xlane.f32.xlu0 %v919_v11 }
 0x2f6   : > { %v916_v13 = vsel %vm885_vm8, %v1556_v12, 0.0 }
 0x2f7   : > { %917 = vadd.xlane.f32.xlu1 %v916_v13 }
 0x374   : > { %v912_v16 = vpop.xlane.xlu1 %911 }
 0x375   : > { %1557 = vrcp.f32 %v912_v16 }
 0x378   : > { %v915_v17 = vpop.xlane.xlu0 %914 }
 0x379   : > { %1559 = vrcp.f32 %v915_v17 }
 0x37f   : > { %v1558_v18 = vpop.eup %1557 }
 0x380   : > { %v923_v19 = vmul.f32 %v1558_v18, %v1550_v1 }
 0x382   : > { %1166 = vst.msk [vmem:[%s290_s26] sm:$0xff] %vm885_vm8, %v923_v19  ;;  %932 = vperm.xlu1 %1470, %v923_v19   ;;  %1031 = vperm.xlu0 %1472, %v923_v19   ;;  %v921_v20 = vpop.xlane.xlu0 %920 }
 0x383   : > { %v1560_v21 = vpop.eup %1559  ;;  %1561 = vrcp.f32 %v921_v20 }
 0x384   : > { %v925_v22 = vmul.f32 %v1560_v21, %v1552_v6  ;;  %v918_v23 = vpop.xlane.xlu1 %917 }
 0x385   : > { %1563 = vrcp.f32 %v918_v23 }
 0x386   : > { %1167 = vst.msk [vmem:[%s290_s26 + $0x8] sm:$0xff] %vm885_vm8, %v925_v22  ;;  %1471 = vset.pattern.permute.xlu1 %v1614_v24  ;;  %1473 = vset.pattern.permute.xlu0 %v1615_v25 }
 0x387   : > { %967 = vperm.xlu1 %1471, %v923_v19   ;;  %1095 = vperm.xlu0 %1473, %v923_v19  }
 0x38b   : > { %1474 = vset.pattern.permute.xlu0 %v1613_v15  ;;  %971 = vperm.xlu1 %1471, %v925_v22  }
 0x38c   : > { %937 = vperm.xlu0 %1474, %v925_v22  }
 0x38d   : > { %v1562_v26 = vpop.eup %1561 }
 0x38e   : > { %v929_v31 = vmul.f32 %v1562_v26, %v1554_v10 }
 0x38f   : > { %v1564_v28 = vpop.eup %1563  ;;  %1475 = vset.pattern.permute.xlu1 %v1612_v14 }
 0x390   : > { %v927_v30 = vmul.f32 %v1564_v28, %v1556_v12  ;;  %1035 = vperm.xlu1 %1475, %v925_v22   ;;  %1480 = vset.pattern.permute.xlu0 %v1615_v25  ;;  %1169 = vst.msk [vmem:[%s290_s26 + $0x18] sm:$0xff] %vm885_vm8, %v929_v31 }
 0x392   : > { %1168 = vst.msk [vmem:[%s290_s26 + $0x10] sm:$0xff] %vm885_vm8, %v927_v30  ;;  %1103 = vperm.xlu0 %1480, %v927_v30  }
 0x394   : > { %1476 = vset.pattern.permute.xlu1 %v1615_v25 }
 0x395   : > { %1099 = vperm.xlu1 %1476, %v925_v22  }
 0x399   : > { %1477 = vset.pattern.permute.xlu1 %v1613_v15 }
 0x39a   : > { %942 = vperm.xlu1 %1477, %v927_v30  }
 0x39e   : > { %1478 = vset.pattern.permute.xlu1 %v1614_v24 }
 0x39f   : > { %975 = vperm.xlu1 %1478, %v927_v30  }
 0x3a3   : > { %1479 = vset.pattern.permute.xlu1 %v1612_v14 }
 0x3a4   : > { %1039 = vperm.xlu1 %1479, %v927_v30  }
 0x3a8   : > { %1481 = vset.pattern.permute.xlu1 %v1613_v15 }
 0x3a9   : > { %947 = vperm.xlu1 %1481, %v929_v31  }
 0x3ad   : > { %1482 = vset.pattern.permute.xlu1 %v1614_v24 }
 0x3ae   : > { %979 = vperm.xlu1 %1482, %v929_v31  }
 0x3b2   : > { %1483 = vset.pattern.permute.xlu1 %v1612_v14 }
 0x3b3   : > { %1043 = vperm.xlu1 %1483, %v929_v31  }
 0x3b7   : > { %1484 = vset.pattern.permute.xlu1 %v1615_v25 }
 0x3b8   : > { %1107 = vperm.xlu1 %1484, %v929_v31  }
 0x401   : > { %v1890_v33 = vpop.permute.xlu1 %932  ;;  %v1032_v36 = vpop.permute.xlu0 %1031 }
 0x402   : > { %v1046_v39 = vmul.f32 %v1032_v36, %v1815_v38  ;;  %v1070_v43 = vmul.f32 %v1032_v36, %v1799_v7  ;;  %v950_v18 = vmul.f32 %v1890_v33, %v1815_v38  ;;  %v958_v22 = vmul.f32 %v1890_v33, %v1799_v7 }
 0x406   : > { %v968_v58 = vpop.permute.xlu1 %967  ;;  %v1096_v48 = vpop.permute.xlu0 %1095 }
 0x407   : > { %v982_v34 = vmul.f32 %v968_v58, %v1815_v38  ;;  %v1006_v35 = vmul.f32 %v968_v58, %v1799_v7  ;;  %v1110_v32 = vmul.f32 %v1096_v48, %v1815_v38  ;;  %v1134_v29 = vmul.f32 %v1096_v48, %v1799_v7 }
 0x409   : > { %1014 = vrot.lane.b32.xlu0 %v1006_v35, %s1611_s23  ;;  %990 = vrot.lane.b32.xlu1 %v982_v34, %s1611_s23 }
 0x40a   : > { %v972_v37 = vpop.permute.xlu1 %971 }
 0x40b   : > { %v983_v42 = vmul.f32 %v972_v37, %v1822_v44  ;;  %v1007_v45 = vmul.f32 %v972_v37, %v1804_v49  ;;  %v938_v63 = vpop.permute.xlu0 %937 }
 0x40c   : > { %v951_v38 = vmul.f32 %v938_v63, %v1822_v44  ;;  %v959_v34 = vmul.f32 %v938_v63, %v1804_v49 }
 0x40d   : > { %992 = vrot.lane.b32.xlu1 %v983_v42, %s1611_s23  ;;  %1054 = vrot.lane.b32.xlu0 %v1046_v39, %s1610_s22 }
 0x40f   : > { %v1036_v46 = vpop.permute.xlu1 %1035 }
 0x410   : > { %v1047_v52 = vmul.f32 %v1036_v46, %v1822_v44  ;;  %v1071_v54 = vmul.f32 %v1036_v46, %v1804_v49 }
 0x411   : > { %1016 = vrot.lane.b32.xlu1 %v1007_v45, %s1611_s23  ;;  %1078 = vrot.lane.b32.xlu0 %v1070_v43, %s1610_s22  ;;  %v1104_v2 = vpop.permute.xlu0 %1103 }
 0x412   : > { %v1112_v5 = vmul.f32 %v1104_v2, %v1830_v50  ;;  %v1136_v6 = vmul.f32 %v1104_v2, %v1810_v27 }
 0x414   : > { %v1100_v53 = vpop.permute.xlu1 %1099 }
 0x415   : > { %1056 = vrot.lane.b32.xlu1 %v1047_v52, %s1610_s22  ;;  %1118 = vrot.lane.b32.xlu0 %v1110_v32, %s1609_s21  ;;  %v1111_v56 = vmul.f32 %v1100_v53, %v1822_v44  ;;  %v1135_v51 = vmul.f32 %v1100_v53, %v1804_v49 }
 0x419   : > { %v1910_v41 = vpop.permute.xlu1 %942  ;;  %1080 = vrot.lane.b32.xlu1 %v1071_v54, %s1610_s22  ;;  %1142 = vrot.lane.b32.xlu0 %v1134_v29, %s1609_s21 }
 0x41a   : > { %v952_v49 = vmul.f32 %v1910_v41, %v1830_v50  ;;  %v960_v53 = vmul.f32 %v1910_v41, %v1810_v27 }
 0x41d   : > { %1120 = vrot.lane.b32.xlu1 %v1111_v56, %s1609_s21 }
 0x41e   : > { %v976_v57 = vpop.permute.xlu1 %975 }
 0x41f   : > { %v984_v59 = vmul.f32 %v976_v57, %v1830_v50  ;;  %v1008_v60 = vmul.f32 %v976_v57, %v1810_v27 }
 0x421   : > { %1144 = vrot.lane.b32.xlu1 %v1135_v51, %s1609_s21  ;;  %994 = vrot.lane.b32.xlu0 %v984_v59, %s1611_s23 }
 0x423   : > { %v1040_v61 = vpop.permute.xlu1 %1039 }
 0x424   : > { %v1048_v62 = vmul.f32 %v1040_v61, %v1830_v50  ;;  %v1072_v1 = vmul.f32 %v1040_v61, %v1810_v27 }
 0x425   : > { %1018 = vrot.lane.b32.xlu0 %v1008_v60, %s1611_s23 }
 0x428   : > { %v1923_v0 = vpop.permute.xlu1 %947 }
 0x429   : > { %1058 = vrot.lane.b32.xlu0 %v1048_v62, %s1610_s22  ;;  %v953_v63 = vmul.f32 %v1923_v0, %v1836_v55 }
 0x42d   : > { %v980_v3 = vpop.permute.xlu1 %979  ;;  %1082 = vrot.lane.b32.xlu0 %v1072_v1, %s1610_s22  ;;  %v961_v1 = vmul.f32 %v1923_v0, %v1817_v40 }
 0x42e   : > { %v985_v4 = vmul.f32 %v980_v3, %v1836_v55  ;;  %v1009_v47 = vmul.f32 %v980_v3, %v1817_v40 }
 0x430   : > { %996 = vrot.lane.b32.xlu1 %v985_v4, %s1611_s23 }
 0x431   : > { %1122 = vrot.lane.b32.xlu0 %v1112_v5, %s1609_s21 }
 0x432   : > { %v1044_v8 = vpop.permute.xlu1 %1043 }
 0x433   : > { %v1049_v9 = vmul.f32 %v1044_v8, %v1836_v55  ;;  %v1073_v10 = vmul.f32 %v1044_v8, %v1817_v40 }
 0x434   : > { %1020 = vrot.lane.b32.xlu1 %v1009_v47, %s1611_s23 }
 0x435   : > { %1146 = vrot.lane.b32.xlu0 %v1136_v6, %s1609_s21 }
 0x437   : > { %v1108_v11 = vpop.permute.xlu1 %1107 }
 0x438   : > { %1060 = vrot.lane.b32.xlu1 %v1049_v9, %s1610_s22  ;;  %v1113_v12 = vmul.f32 %v1108_v11, %v1836_v55  ;;  %v1137_v13 = vmul.f32 %v1108_v11, %v1817_v40 }
 0x43c   : > { %1084 = vrot.lane.b32.xlu1 %v1073_v10, %s1610_s22 }
 0x440   : > { %1124 = vrot.lane.b32.xlu1 %v1113_v12, %s1609_s21 }
 0x444   : > { %1148 = vrot.lane.b32.xlu1 %v1137_v13, %s1609_s21 }
 0x47b   : > { %v991_v14 = vpop.permute.xlu1 %990  ;;  %v1015_v15 = vpop.permute.xlu0 %1014 }
 0x47c   : > { %v1002_v21 = vadd.f32 %v991_v14, %v950_v18  ;;  %v1026_v26 = vadd.f32 %v1015_v15, %v958_v22 }
 0x47f   : > { %v993_v16 = vpop.permute.xlu1 %992  ;;  %v1055_v17 = vpop.permute.xlu0 %1054 }
 0x480   : > { %v1066_v23 = vadd.f32 %v1055_v17, %v1002_v21  ;;  %v1003_v33 = vadd.f32 %v993_v16, %v951_v38 }
 0x483   : > { %v1017_v19 = vpop.permute.xlu1 %1016  ;;  %v1079_v20 = vpop.permute.xlu0 %1078 }
 0x484   : > { %v1090_v30 = vadd.f32 %v1079_v20, %v1026_v26  ;;  %v1027_v36 = vadd.f32 %v1017_v19, %v959_v34 }
 0x487   : > { %v1057_v24 = vpop.permute.xlu1 %1056  ;;  %v1119_v25 = vpop.permute.xlu0 %1118 }
 0x488   : > { %v1130_v28 = vadd.f32 %v1119_v25, %v1066_v23  ;;  %v1067_v35 = vadd.f32 %v1057_v24, %v1003_v33 }
 0x48a   : > { %1158 = vst.msk [vmem:[%s1952_s29] sm:$0xff] %vm743_vm2, %v1130_v28 }
 0x48b   : > { %v1081_v31 = vpop.permute.xlu1 %1080  ;;  %v1143_v7 = vpop.permute.xlu0 %1142 }
 0x48c   : > { %v1154_v58 = vadd.f32 %v1143_v7, %v1090_v30  ;;  %v1091_v39 = vadd.f32 %v1081_v31, %v1027_v36 }
 0x48e   : > { %1162 = vst.msk [vmem:[%s1961_s7] sm:$0xff] %vm743_vm2, %v1154_v58 }
 0x48f   : > { %v1121_v44 = vpop.permute.xlu1 %1120 }
 0x490   : > { %v1131_v37 = vadd.f32 %v1121_v44, %v1067_v35 }
 0x492   : > { %1159 = vst.msk [vmem:[%s1952_s29 + $0x8] sm:$0xff] %vm743_vm2, %v1131_v37 }
 0x493   : > { %v1145_v42 = vpop.permute.xlu1 %1144  ;;  %v995_v43 = vpop.permute.xlu0 %994 }
 0x494   : > { %v1155_v45 = vadd.f32 %v1145_v42, %v1091_v39  ;;  %v1004_v52 = vadd.f32 %v995_v43, %v952_v49 }
 0x496   : > { %1163 = vst.msk [vmem:[%s1961_s7 + $0x8] sm:$0xff] %vm743_vm2, %v1155_v45 }
 0x497   : > { %v1019_v46 = vpop.permute.xlu0 %1018 }
 0x498   : > { %v1028_v57 = vadd.f32 %v1019_v46, %v960_v53 }
 0x49b   : > { %v1059_v48 = vpop.permute.xlu0 %1058 }
 0x49c   : > { %v1068_v29 = vadd.f32 %v1059_v48, %v1004_v52 }
 0x49f   : > { %v1083_v32 = vpop.permute.xlu0 %1082 }
 0x4a0   : > { %v1092_v59 = vadd.f32 %v1083_v32, %v1028_v57 }
 0x4a2   : > { %v997_v54 = vpop.permute.xlu1 %996 }
 0x4a3   : > { %v1123_v56 = vpop.permute.xlu0 %1122  ;;  %v1005_v41 = vadd.f32 %v997_v54, %v953_v63 }
 0x4a4   : > { %v1132_v51 = vadd.f32 %v1123_v56, %v1068_v29 }
 0x4a6   : > { %1160 = vst.msk [vmem:[%s1952_s29 + $0x10] sm:$0xff] %vm743_vm2, %v1132_v51  ;;  %v1021_v60 = vpop.permute.xlu1 %1020 }
 0x4a7   : > { %v1147_v61 = vpop.permute.xlu0 %1146  ;;  %v1029_v4 = vadd.f32 %v1021_v60, %v961_v1 }
 0x4a8   : > { %v1156_v62 = vadd.f32 %v1147_v61, %v1092_v59 }
 0x4aa   : > { %1164 = vst.msk [vmem:[%s1961_s7 + $0x10] sm:$0xff] %vm743_vm2, %v1156_v62  ;;  %v1061_v50 = vpop.permute.xlu1 %1060 }
 0x4ab   : > { %v1069_v2 = vadd.f32 %v1061_v50, %v1005_v41 }
 0x4ae   : > { %v1085_v27 = vpop.permute.xlu1 %1084 }
 0x4af   : > { %v1093_v47 = vadd.f32 %v1085_v27, %v1029_v4 }
 0x4b2   : > { %v1125_v3 = vpop.permute.xlu1 %1124 }
 0x4b3   : > { %v1133_v5 = vadd.f32 %v1125_v3, %v1069_v2 }
 0x4b5   : > { %1161 = vst.msk [vmem:[%s1952_s29 + $0x18] sm:$0xff] %vm743_vm2, %v1133_v5 }
 0x4b6   : > { %v1149_v6 = vpop.permute.xlu1 %1148 }
 0x4b7   : > { %v1157_v8 = vadd.f32 %v1149_v6, %v1093_v47 }
 0x4b9   : > { %1165 = vst.msk [vmem:[%s1961_s7 + $0x18] sm:$0xff] %vm743_vm2, %v1157_v8 }
 0x4ba PF: > { %s17_s18 = sadd.s32 1, %s1603_s18  }
 0x4bb   : > { %p14_p3 = scmp.ge.s32.totalorder %s17_s18, 4  }
 0x4bd   :  { %16 = sbr.rel (!%p14_p3) target bundleno = 1 (0x1), region = 94 }
 0x4c4   :  { %1226 = vsyncpa [#allocation3], 1 }
 0x4c5   :  { %1228 = vsyncpa [#allocation3 + $0x1], 1 }

</bundles_post_ra>
